<compile_context>
chip_gen: v6e
topology: v6e:2x2x1
jax: 0.10.0
libtpu: 0.0.40
codegen_flags: <defaults>
</compile_context>

<pallas_src>
import functools
import math

import jax
import jax.numpy as jnp
from jax import lax
from jax.experimental import pallas as pl
from jax.experimental.pallas import tpu as pltpu


# ----------------------------- Pallas kernel -------------------------------

def _mha_kernel(*refs, num_heads, head_dim, has_mask, compute_dtype):
    if has_mask:
        (q_ref, k_ref, v_ref, mask_ref,
         wq_ref, wk_ref, wv_ref, wo_ref, bo_ref,
         o_ref, kp_ref, vp_ref) = refs
    else:
        (q_ref, k_ref, v_ref,
         wq_ref, wk_ref, wv_ref, wo_ref, bo_ref,
         o_ref, kp_ref, vp_ref) = refs
        mask_ref = None

    qi = pl.program_id(1)

    # K / V are identical for every q tile of a batch element: project them
    # once (qi == 0) and keep the result resident in VMEM scratch across the
    # (sequential, "arbitrary") q-tile axis.
    @pl.when(qi == 0)
    def _():
        k = k_ref[0].astype(compute_dtype)          # (Lk, E)
        v = v_ref[0].astype(compute_dtype)          # (Lv, E)
        kp_ref[...] = jnp.dot(
            k, wk_ref[...].astype(compute_dtype),
            preferred_element_type=jnp.float32).astype(kp_ref.dtype)
        vp_ref[...] = jnp.dot(
            v, wv_ref[...].astype(compute_dtype),
            preferred_element_type=jnp.float32).astype(vp_ref.dtype)

    # Q projection: single lane-dense (Tq, E) @ (E, E) matmul; the softmax
    # scale is already folded into wq host-side.
    q = q_ref[0].astype(compute_dtype)               # (Tq, E)
    qp = jnp.dot(q, wq_ref[...].astype(compute_dtype),
                 preferred_element_type=jnp.float32)  # (Tq, E), f32, pre-scaled

    kp = kp_ref[...]                                 # (Lk, E), compute_dtype
    vp = vp_ref[...]                                 # (Lv, E), compute_dtype

    if has_mask:
        masked = mask_ref[0, 0] == 0                 # (Tq, Lk), shared by heads

    y = None
    for h in range(num_heads):                       # static unroll over heads
        sl = slice(h * head_dim, (h + 1) * head_dim)
        qh = qp[:, sl].astype(compute_dtype)         # (Tq, D)
        kh = kp[:, sl]                               # (Lk, D)
        vh = vp[:, sl]                               # (Lk, D)

        # energy = qh @ kh^T : contract over head_dim, no in-kernel transpose.
        energy = lax.dot_general(qh, kh, (((1,), (1,)), ((), ())),
                                 preferred_element_type=jnp.float32)  # (Tq, Lk)
        if has_mask:
            energy = jnp.where(masked, jnp.float32(-1e20), energy)

        # f32 softmax over keys; approx reciprocal runs on the EUP slot.
        e_max = jnp.max(energy, axis=-1, keepdims=True)
        p = jnp.exp(energy - e_max)
        attn = p * pl.reciprocal(jnp.sum(p, axis=-1, keepdims=True), approx=True)

        ctx_h = jnp.dot(attn.astype(compute_dtype), vh,
                        preferred_element_type=jnp.float32)           # (Tq, D)

        # fc_out fused & distributed over heads: sum_h ctx_h @ Wo^T[hD:(h+1)D].
        wo_h = wo_ref[sl, :].astype(compute_dtype)                     # (D, E)
        contrib = jnp.dot(ctx_h.astype(compute_dtype), wo_h,
                          preferred_element_type=jnp.float32)          # (Tq, E)
        y = contrib if y is None else y + contrib

    o_ref[0] = (y + bo_ref[...]).astype(o_ref.dtype)


# ------------------------------ Python wrapper ------------------------------

def _pick_q_tile(q_len):
    for t in (256, 128, 64, 32, 16, 8):
        if q_len % t == 0:
            return t
    return q_len  # small / odd sequence: one full-length tile


def multi_head_attention(values, keys, query, mask, params,
                         *, embed_size, num_heads,
                         compute_dtype=jnp.float32):
    """Forward pass matching the PyTorch MultiHeadAttention module."""
    head_dim = embed_size // num_heads
    assert head_dim * num_heads == embed_size
    N, q_len, _ = query.shape
    k_len = keys.shape[1]
    v_len = values.shape[1]
    assert k_len == v_len

    # One-time host-side layout plumbing (no per-step in-kernel transposes):
    # shared per-head (D, D) weights -> pre-transposed block-diagonal (E, E);
    # the 1/sqrt(E) softmax scale is folded into the Q weights.
    scale = 1.0 / math.sqrt(float(embed_size))
    eye_h = jnp.eye(num_heads, dtype=jnp.float32)
    wq_bd = jnp.kron(eye_h, params["wq"].T) * scale  # x @ wq_bd == per-head (x @ Wq^T) * scale
    wk_bd = jnp.kron(eye_h, params["wk"].T)
    wv_bd = jnp.kron(eye_h, params["wv"].T)
    w_fc_t = params["w_fc"].T                        # (E, E)
    b_fc = params["b_fc"].reshape(1, embed_size)

    tile_q = _pick_q_tile(q_len)
    grid = (N, q_len // tile_q)
    has_mask = mask is not None

    in_specs = [
        pl.BlockSpec((1, tile_q, embed_size), lambda n, qi: (n, qi, 0)),   # q
        pl.BlockSpec((1, k_len, embed_size), lambda n, qi: (n, 0, 0)),     # k
        pl.BlockSpec((1, v_len, embed_size), lambda n, qi: (n, 0, 0)),     # v
    ]
    inputs = [query, keys, values]

    if has_mask:
        # Keep the mask head-shared at (N, 1, Lq, Lk): no H-times HBM traffic.
        mask_b = jnp.broadcast_to(mask.astype(jnp.float32),
                                  (N, 1, q_len, k_len))
        in_specs.append(
            pl.BlockSpec((1, 1, tile_q, k_len), lambda n, qi: (n, 0, qi, 0)))
        inputs.append(mask_b)

    in_specs += [
        pl.BlockSpec((embed_size, embed_size), lambda n, qi: (0, 0)),      # wq (scaled)
        pl.BlockSpec((embed_size, embed_size), lambda n, qi: (0, 0)),      # wk
        pl.BlockSpec((embed_size, embed_size), lambda n, qi: (0, 0)),      # wv
        pl.BlockSpec((embed_size, embed_size), lambda n, qi: (0, 0)),      # w_fc^T
        pl.BlockSpec((1, embed_size), lambda n, qi: (0, 0)),               # b_fc
    ]
    inputs += [wq_bd, wk_bd, wv_bd, w_fc_t, b_fc]

    kernel = functools.partial(
        _mha_kernel, num_heads=num_heads, head_dim=head_dim,
        has_mask=has_mask, compute_dtype=compute_dtype)

    out = pl.pallas_call(
        kernel,
        out_shape=jax.ShapeDtypeStruct((N, q_len, embed_size), jnp.float32),
        grid_spec=pltpu.PrefetchScalarGridSpec(
            num_scalar_prefetch=0,
            grid=grid,
            in_specs=in_specs,
            out_specs=pl.BlockSpec((1, tile_q, embed_size),
                                   lambda n, qi: (n, qi, 0)),
            scratch_shapes=[
                pltpu.VMEM((k_len, embed_size), compute_dtype),   # projected K
                pltpu.VMEM((v_len, embed_size), compute_dtype),   # projected V
            ],
        ),
        # Batch axis is parallel (megacore); q-tile axis is sequential so the
        # projected-K/V scratch computed at qi == 0 is reused by later tiles.
        compiler_params=pltpu.CompilerParams(
            dimension_semantics=("parallel", "arbitrary")),
    )(*inputs)
    return out


# ------------------------------ JAX reference -------------------------------

def multi_head_attention_ref(values, keys, query, mask, params,
                             *, embed_size, num_heads):
    head_dim = embed_size // num_heads
    N, q_len, _ = query.shape
    k_len, v_len = keys.shape[1], values.shape[1]
    v = values.reshape(N, v_len, num_heads, head_dim) @ params["wv"].T
    k = keys.reshape(N, k_len, num_heads, head_dim) @ params["wk"].T
    q = query.reshape(N, q_len, num_heads, head_dim) @ params["wq"].T
    energy = jnp.einsum("nqhd,nkhd->nhqk", q, k)
    if mask is not None:
        energy = jnp.where(mask == 0, jnp.float32(-1e20), energy)
    attn = jax.nn.softmax(energy / math.sqrt(float(embed_size)), axis=3)
    out = jnp.einsum("nhql,nlhd->nqhd", attn, v).reshape(N, q_len, embed_size)
    return out @ params["w_fc"].T + params["b_fc"][0]


# ---------------------------------- main ------------------------------------

if __name__ == "__main__":
    N, SEQ, EMBED, HEADS = 2, 8, 32, 4
    HEAD_DIM = EMBED // HEADS

    root = jax.random.PRNGKey(0)
    kq, kk, kv, kwq, kwk, kwv, kwo, kbo, kmask = jax.random.split(root, 9)

    query = jax.random.normal(kq, (N, SEQ, EMBED), jnp.float32)
    keys = jax.random.normal(kk, (N, SEQ, EMBED), jnp.float32)
    values = jax.random.normal(kv, (N, SEQ, EMBED), jnp.float32)

    # Deterministic parameter init (PyTorch-style uniform +-1/sqrt(fan_in)).
    bd = 1.0 / math.sqrt(HEAD_DIM)
    be = 1.0 / math.sqrt(EMBED)
    params = {
        "wq": jax.random.uniform(kwq, (HEAD_DIM, HEAD_DIM), jnp.float32, -bd, bd),
        "wk": jax.random.uniform(kwk, (HEAD_DIM, HEAD_DIM), jnp.float32, -bd, bd),
        "wv": jax.random.uniform(kwv, (HEAD_DIM, HEAD_DIM), jnp.float32, -bd, bd),
        "w_fc": jax.random.uniform(kwo, (EMBED, EMBED), jnp.float32, -be, be),
        "b_fc": jax.random.uniform(kbo, (1, EMBED), jnp.float32, -be, be),
    }

    # mask: (N, 1, Lq, Lk) of 0/1, broadcast over heads (padding-style mask).
    mask = (jax.random.uniform(kmask, (N, 1, SEQ, SEQ)) > 0.2).astype(jnp.float32)
    # ensure the diagonal is always attendable so no row is fully masked
    mask = jnp.maximum(mask, jnp.eye(SEQ, dtype=jnp.float32)[None, None])

    out = multi_head_attention(values, keys, query, mask, params,
                               embed_size=EMBED, num_heads=HEADS)
    out = jax.block_until_ready(out)

    ref = multi_head_attention_ref(values, keys, query, mask, params,
                                   embed_size=EMBED, num_heads=HEADS)
    assert out.shape == (N, SEQ, EMBED)
    # Tolerance is slightly looser than f32 round-off because the softmax
    # denominator uses the EUP approximate reciprocal (pl.reciprocal(approx=True)).
    assert jnp.allclose(out, ref, atol=5e-3, rtol=5e-3), "mismatch vs reference"

    print("KERNEL_OK")
</pallas_src>

<mosaic_0001>
module attributes {stable_mosaic.version = 11 : i64} {
  func.func @_mha_kernel(%arg0: i32, %arg1: i32, %arg2: memref<1x8x32xf32, #tpu.memory_space<vmem>>, %arg3: memref<1x8x32xf32, #tpu.memory_space<vmem>>, %arg4: memref<1x8x32xf32, #tpu.memory_space<vmem>>, %arg5: memref<1x1x8x8xf32, #tpu.memory_space<vmem>>, %arg6: memref<32x32xf32, #tpu.memory_space<vmem>>, %arg7: memref<32x32xf32, #tpu.memory_space<vmem>>, %arg8: memref<32x32xf32, #tpu.memory_space<vmem>>, %arg9: memref<32x32xf32, #tpu.memory_space<vmem>>, %arg10: memref<1x32xf32, #tpu.memory_space<vmem>>, %arg11: memref<1x8x32xf32, #tpu.memory_space<vmem>>, %arg12: memref<8x32xf32, #tpu.memory_space<vmem>>, %arg13: memref<8x32xf32, #tpu.memory_space<vmem>>) attributes {dimension_semantics = [#tpu.dimension_semantics<parallel>, #tpu.dimension_semantics<arbitrary>], iteration_bounds = array<i64: 2, 1>, scalar_prefetch = 0 : i64, scratch_operands = 2 : i64, tpu.core_type = #tpu.core_type<tc>, window_params = [{transform_indices = @transform_0, window_bounds = array<i64: 1, 8, 32>}, {transform_indices = @transform_1, window_bounds = array<i64: 1, 8, 32>}, {transform_indices = @transform_2, window_bounds = array<i64: 1, 8, 32>}, {transform_indices = @transform_3, window_bounds = array<i64: 1, 1, 8, 8>}, {pipeline_mode = #tpu.pipeline_mode<synchronous>, transform_indices = @transform_4, window_bounds = array<i64: 32, 32>}, {pipeline_mode = #tpu.pipeline_mode<synchronous>, transform_indices = @transform_5, window_bounds = array<i64: 32, 32>}, {pipeline_mode = #tpu.pipeline_mode<synchronous>, transform_indices = @transform_6, window_bounds = array<i64: 32, 32>}, {pipeline_mode = #tpu.pipeline_mode<synchronous>, transform_indices = @transform_7, window_bounds = array<i64: 32, 32>}, {pipeline_mode = #tpu.pipeline_mode<synchronous>, transform_indices = @transform_8, window_bounds = array<i64: 1, 32>}, {transform_indices = @transform_9, window_bounds = array<i64: 1, 8, 32>}]} {
    %c0_i32 = arith.constant 0 : i32
    %0 = arith.cmpi eq, %arg1, %c0_i32 : i32
    %1 = arith.extui %0 : i1 to i32
    %c0_i32_0 = arith.constant 0 : i32
    %2 = arith.cmpi ne, %1, %c0_i32_0 : i32
    scf.if %2 {
      %c0_48 = arith.constant 0 : index
      %c0_49 = arith.constant 0 : index
      %c0_50 = arith.constant 0 : index
      %98 = vector.load %arg3[%c0_48, %c0_49, %c0_50] : memref<1x8x32xf32, #tpu.memory_space<vmem>>, vector<1x8x32xf32>
      %99 = vector.shape_cast %98 : vector<1x8x32xf32> to vector<8x32xf32>
      %c0_51 = arith.constant 0 : index
      %c0_52 = arith.constant 0 : index
      %c0_53 = arith.constant 0 : index
      %100 = vector.load %arg4[%c0_51, %c0_52, %c0_53] : memref<1x8x32xf32, #tpu.memory_space<vmem>>, vector<1x8x32xf32>
      %101 = vector.shape_cast %100 : vector<1x8x32xf32> to vector<8x32xf32>
      %c0_54 = arith.constant 0 : index
      %c0_55 = arith.constant 0 : index
      %102 = vector.load %arg7[%c0_54, %c0_55] : memref<32x32xf32, #tpu.memory_space<vmem>>, vector<32x32xf32>
      %cst_56 = arith.constant dense<0.000000e+00> : vector<8x32xf32>
      %103 = tpu.matmul %99, %102, %cst_56 {dimension_numbers = #tpu.dot_dimension_numbers<[1], [0], [0], [1], [0, 0, 1, 1], [], []>} : vector<8x32xf32>, vector<32x32xf32>, vector<8x32xf32> -> vector<8x32xf32>
      %c0_57 = arith.constant 0 : index
      %c0_58 = arith.constant 0 : index
      %104 = vector.load %arg12[%c0_57, %c0_58] : memref<8x32xf32, #tpu.memory_space<vmem>>, vector<8x32xf32>
      tpu.vector_store %arg12[%c0_57, %c0_58], %103 {strides = array<i32>} : memref<8x32xf32, #tpu.memory_space<vmem>>, vector<8x32xf32>,
      %c0_59 = arith.constant 0 : index
      %c0_60 = arith.constant 0 : index
      %105 = vector.load %arg8[%c0_59, %c0_60] : memref<32x32xf32, #tpu.memory_space<vmem>>, vector<32x32xf32>
      %cst_61 = arith.constant dense<0.000000e+00> : vector<8x32xf32>
      %106 = tpu.matmul %101, %105, %cst_61 {dimension_numbers = #tpu.dot_dimension_numbers<[1], [0], [0], [1], [0, 0, 1, 1], [], []>} : vector<8x32xf32>, vector<32x32xf32>, vector<8x32xf32> -> vector<8x32xf32>
      %c0_62 = arith.constant 0 : index
      %c0_63 = arith.constant 0 : index
      %107 = vector.load %arg13[%c0_62, %c0_63] : memref<8x32xf32, #tpu.memory_space<vmem>>, vector<8x32xf32>
      tpu.vector_store %arg13[%c0_62, %c0_63], %106 {strides = array<i32>} : memref<8x32xf32, #tpu.memory_space<vmem>>, vector<8x32xf32>,
    } else {
    }
    %c0 = arith.constant 0 : index
    %c0_1 = arith.constant 0 : index
    %c0_2 = arith.constant 0 : index
    %3 = vector.load %arg2[%c0, %c0_1, %c0_2] : memref<1x8x32xf32, #tpu.memory_space<vmem>>, vector<1x8x32xf32>
    %4 = vector.shape_cast %3 : vector<1x8x32xf32> to vector<8x32xf32>
    %c0_3 = arith.constant 0 : index
    %c0_4 = arith.constant 0 : index
    %5 = vector.load %arg6[%c0_3, %c0_4] : memref<32x32xf32, #tpu.memory_space<vmem>>, vector<32x32xf32>
    %cst = arith.constant dense<0.000000e+00> : vector<8x32xf32>
    %6 = tpu.matmul %4, %5, %cst {dimension_numbers = #tpu.dot_dimension_numbers<[1], [0], [0], [1], [0, 0, 1, 1], [], []>} : vector<8x32xf32>, vector<32x32xf32>, vector<8x32xf32> -> vector<8x32xf32>
    %c0_5 = arith.constant 0 : index
    %c0_6 = arith.constant 0 : index
    %7 = vector.load %arg12[%c0_5, %c0_6] : memref<8x32xf32, #tpu.memory_space<vmem>>, vector<8x32xf32>
    %c0_7 = arith.constant 0 : index
    %c0_8 = arith.constant 0 : index
    %8 = vector.load %arg13[%c0_7, %c0_8] : memref<8x32xf32, #tpu.memory_space<vmem>>, vector<8x32xf32>
    %c0_9 = arith.constant 0 : index
    %c0_10 = arith.constant 0 : index
    %c0_11 = arith.constant 0 : index
    %c0_12 = arith.constant 0 : index
    %9 = vector.load %arg5[%c0_9, %c0_10, %c0_11, %c0_12] : memref<1x1x8x8xf32, #tpu.memory_space<vmem>>, vector<1x1x8x8xf32>
    %10 = vector.shape_cast %9 : vector<1x1x8x8xf32> to vector<8x8xf32>
    %cst_13 = arith.constant 0.000000e+00 : f32
    %11 = vector.broadcast %cst_13 : f32 to vector<8x8xf32>
    %12 = arith.cmpf oeq, %10, %11 : vector<8x8xf32>
    %13 = vector.extract_strided_slice %6 {offsets = [0, 0], sizes = [8, 8], strides = [1, 1]} : vector<8x32xf32> to vector<8x8xf32>
    %14 = vector.extract_strided_slice %7 {offsets = [0, 0], sizes = [8, 8], strides = [1, 1]} : vector<8x32xf32> to vector<8x8xf32>
    %15 = vector.extract_strided_slice %8 {offsets = [0, 0], sizes = [8, 8], strides = [1, 1]} : vector<8x32xf32> to vector<8x8xf32>
    %cst_14 = arith.constant dense<0.000000e+00> : vector<8x8xf32>
    %16 = tpu.matmul %13, %14, %cst_14 {dimension_numbers = #tpu.dot_dimension_numbers<[1], [1], [0], [0], [0, 0, 1, 0], [], []>} : vector<8x8xf32>, vector<8x8xf32>, vector<8x8xf32> -> vector<8x8xf32>
    %cst_15 = arith.constant -1.000000e+20 : f32
    %17 = vector.broadcast %cst_15 : f32 to vector<8x8xf32>
    %18 = arith.select %12, %17, %16 : vector<8x8xi1>, vector<8x8xf32>
    %cst_16 = arith.constant dense<0xFF800000> : vector<8xf32>
    %19 = vector.multi_reduction <maximumf>, %18, %cst_16 [1] : vector<8x8xf32> to vector<8xf32>
    %20 = vector.shape_cast %19 : vector<8xf32> to vector<8x1xf32>
    %21 = vector.broadcast %20 : vector<8x1xf32> to vector<8x8xf32>
    %22 = arith.subf %18, %21 : vector<8x8xf32>
    %23 = math.exp %22 : vector<8x8xf32>
    %cst_17 = arith.constant dense<0.000000e+00> : vector<8xf32>
    %24 = vector.multi_reduction <add>, %23, %cst_17 [1] : vector<8x8xf32> to vector<8xf32>
    %25 = vector.shape_cast %24 : vector<8xf32> to vector<8x1xf32>
    %26 = tpu.reciprocal %25 {approx = true} : vector<8x1xf32> -> vector<8x1xf32>
    %27 = vector.broadcast %26 : vector<8x1xf32> to vector<8x8xf32>
    %28 = arith.mulf %23, %27 : vector<8x8xf32>
    %cst_18 = arith.constant dense<0.000000e+00> : vector<8x8xf32>
    %29 = tpu.matmul %28, %15, %cst_18 {dimension_numbers = #tpu.dot_dimension_numbers<[1], [0], [0], [1], [0, 0, 1, 1], [], []>} : vector<8x8xf32>, vector<8x8xf32>, vector<8x8xf32> -> vector<8x8xf32>
    %c0_19 = arith.constant 0 : index
    %c0_20 = arith.constant 0 : index
    %30 = vector.load %arg9[%c0_19, %c0_20] : memref<32x32xf32, #tpu.memory_space<vmem>>, vector<8x32xf32>
    %cst_21 = arith.constant dense<0.000000e+00> : vector<8x32xf32>
    %31 = tpu.matmul %29, %30, %cst_21 {dimension_numbers = #tpu.dot_dimension_numbers<[1], [0], [0], [1], [0, 0, 1, 1], [], []>} : vector<8x8xf32>, vector<8x32xf32>, vector<8x32xf32> -> vector<8x32xf32>
    %32 = vector.extract_strided_slice %6 {offsets = [0, 8], sizes = [8, 8], strides = [1, 1]} : vector<8x32xf32> to vector<8x8xf32>
    %33 = vector.extract_strided_slice %7 {offsets = [0, 8], sizes = [8, 8], strides = [1, 1]} : vector<8x32xf32> to vector<8x8xf32>
    %34 = vector.extract_strided_slice %8 {offsets = [0, 8], sizes = [8, 8], strides = [1, 1]} : vector<8x32xf32> to vector<8x8xf32>
    %cst_22 = arith.constant dense<0.000000e+00> : vector<8x8xf32>
    %35 = tpu.matmul %32, %33, %cst_22 {dimension_numbers = #tpu.dot_dimension_numbers<[1], [1], [0], [0], [0, 0, 1, 0], [], []>} : vector<8x8xf32>, vector<8x8xf32>, vector<8x8xf32> -> vector<8x8xf32>
    %cst_23 = arith.constant -1.000000e+20 : f32
    %36 = vector.broadcast %cst_23 : f32 to vector<8x8xf32>
    %37 = arith.select %12, %36, %35 : vector<8x8xi1>, vector<8x8xf32>
    %cst_24 = arith.constant dense<0xFF800000> : vector<8xf32>
    %38 = vector.multi_reduction <maximumf>, %37, %cst_24 [1] : vector<8x8xf32> to vector<8xf32>
    %39 = vector.shape_cast %38 : vector<8xf32> to vector<8x1xf32>
    %40 = vector.broadcast %39 : vector<8x1xf32> to vector<8x8xf32>
    %41 = arith.subf %37, %40 : vector<8x8xf32>
    %42 = math.exp %41 : vector<8x8xf32>
    %cst_25 = arith.constant dense<0.000000e+00> : vector<8xf32>
    %43 = vector.multi_reduction <add>, %42, %cst_25 [1] : vector<8x8xf32> to vector<8xf32>
    %44 = vector.shape_cast %43 : vector<8xf32> to vector<8x1xf32>
    %45 = tpu.reciprocal %44 {approx = true} : vector<8x1xf32> -> vector<8x1xf32>
    %46 = vector.broadcast %45 : vector<8x1xf32> to vector<8x8xf32>
    %47 = arith.mulf %42, %46 : vector<8x8xf32>
    %cst_26 = arith.constant dense<0.000000e+00> : vector<8x8xf32>
    %48 = tpu.matmul %47, %34, %cst_26 {dimension_numbers = #tpu.dot_dimension_numbers<[1], [0], [0], [1], [0, 0, 1, 1], [], []>} : vector<8x8xf32>, vector<8x8xf32>, vector<8x8xf32> -> vector<8x8xf32>
    %c8 = arith.constant 8 : index
    %c0_27 = arith.constant 0 : index
    %49 = vector.load %arg9[%c8, %c0_27] : memref<32x32xf32, #tpu.memory_space<vmem>>, vector<8x32xf32>
    %cst_28 = arith.constant dense<0.000000e+00> : vector<8x32xf32>
    %50 = tpu.matmul %48, %49, %cst_28 {dimension_numbers = #tpu.dot_dimension_numbers<[1], [0], [0], [1], [0, 0, 1, 1], [], []>} : vector<8x8xf32>, vector<8x32xf32>, vector<8x32xf32> -> vector<8x32xf32>
    %51 = arith.addf %31, %50 : vector<8x32xf32>
    %52 = vector.extract_strided_slice %6 {offsets = [0, 16], sizes = [8, 8], strides = [1, 1]} : vector<8x32xf32> to vector<8x8xf32>
    %53 = vector.extract_strided_slice %7 {offsets = [0, 16], sizes = [8, 8], strides = [1, 1]} : vector<8x32xf32> to vector<8x8xf32>
    %54 = vector.extract_strided_slice %8 {offsets = [0, 16], sizes = [8, 8], strides = [1, 1]} : vector<8x32xf32> to vector<8x8xf32>
    %cst_29 = arith.constant dense<0.000000e+00> : vector<8x8xf32>
    %55 = tpu.matmul %52, %53, %cst_29 {dimension_numbers = #tpu.dot_dimension_numbers<[1], [1], [0], [0], [0, 0, 1, 0], [], []>} : vector<8x8xf32>, vector<8x8xf32>, vector<8x8xf32> -> vector<8x8xf32>
    %cst_30 = arith.constant -1.000000e+20 : f32
    %56 = vector.broadcast %cst_30 : f32 to vector<8x8xf32>
    %57 = arith.select %12, %56, %55 : vector<8x8xi1>, vector<8x8xf32>
    %cst_31 = arith.constant dense<0xFF800000> : vector<8xf32>
    %58 = vector.multi_reduction <maximumf>, %57, %cst_31 [1] : vector<8x8xf32> to vector<8xf32>
    %59 = vector.shape_cast %58 : vector<8xf32> to vector<8x1xf32>
    %60 = vector.broadcast %59 : vector<8x1xf32> to vector<8x8xf32>
    %61 = arith.subf %57, %60 : vector<8x8xf32>
    %62 = math.exp %61 : vector<8x8xf32>
    %cst_32 = arith.constant dense<0.000000e+00> : vector<8xf32>
    %63 = vector.multi_reduction <add>, %62, %cst_32 [1] : vector<8x8xf32> to vector<8xf32>
    %64 = vector.shape_cast %63 : vector<8xf32> to vector<8x1xf32>
    %65 = tpu.reciprocal %64 {approx = true} : vector<8x1xf32> -> vector<8x1xf32>
    %66 = vector.broadcast %65 : vector<8x1xf32> to vector<8x8xf32>
    %67 = arith.mulf %62, %66 : vector<8x8xf32>
    %cst_33 = arith.constant dense<0.000000e+00> : vector<8x8xf32>
    %68 = tpu.matmul %67, %54, %cst_33 {dimension_numbers = #tpu.dot_dimension_numbers<[1], [0], [0], [1], [0, 0, 1, 1], [], []>} : vector<8x8xf32>, vector<8x8xf32>, vector<8x8xf32> -> vector<8x8xf32>
    %c16 = arith.constant 16 : index
    %c0_34 = arith.constant 0 : index
    %69 = vector.load %arg9[%c16, %c0_34] : memref<32x32xf32, #tpu.memory_space<vmem>>, vector<8x32xf32>
    %cst_35 = arith.constant dense<0.000000e+00> : vector<8x32xf32>
    %70 = tpu.matmul %68, %69, %cst_35 {dimension_numbers = #tpu.dot_dimension_numbers<[1], [0], [0], [1], [0, 0, 1, 1], [], []>} : vector<8x8xf32>, vector<8x32xf32>, vector<8x32xf32> -> vector<8x32xf32>
    %71 = arith.addf %51, %70 : vector<8x32xf32>
    %72 = vector.extract_strided_slice %6 {offsets = [0, 24], sizes = [8, 8], strides = [1, 1]} : vector<8x32xf32> to vector<8x8xf32>
    %73 = vector.extract_strided_slice %7 {offsets = [0, 24], sizes = [8, 8], strides = [1, 1]} : vector<8x32xf32> to vector<8x8xf32>
    %74 = vector.extract_strided_slice %8 {offsets = [0, 24], sizes = [8, 8], strides = [1, 1]} : vector<8x32xf32> to vector<8x8xf32>
    %cst_36 = arith.constant dense<0.000000e+00> : vector<8x8xf32>
    %75 = tpu.matmul %72, %73, %cst_36 {dimension_numbers = #tpu.dot_dimension_numbers<[1], [1], [0], [0], [0, 0, 1, 0], [], []>} : vector<8x8xf32>, vector<8x8xf32>, vector<8x8xf32> -> vector<8x8xf32>
    %cst_37 = arith.constant -1.000000e+20 : f32
    %76 = vector.broadcast %cst_37 : f32 to vector<8x8xf32>
    %77 = arith.select %12, %76, %75 : vector<8x8xi1>, vector<8x8xf32>
    %cst_38 = arith.constant dense<0xFF800000> : vector<8xf32>
    %78 = vector.multi_reduction <maximumf>, %77, %cst_38 [1] : vector<8x8xf32> to vector<8xf32>
    %79 = vector.shape_cast %78 : vector<8xf32> to vector<8x1xf32>
    %80 = vector.broadcast %79 : vector<8x1xf32> to vector<8x8xf32>
    %81 = arith.subf %77, %80 : vector<8x8xf32>
    %82 = math.exp %81 : vector<8x8xf32>
    %cst_39 = arith.constant dense<0.000000e+00> : vector<8xf32>
    %83 = vector.multi_reduction <add>, %82, %cst_39 [1] : vector<8x8xf32> to vector<8xf32>
    %84 = vector.shape_cast %83 : vector<8xf32> to vector<8x1xf32>
    %85 = tpu.reciprocal %84 {approx = true} : vector<8x1xf32> -> vector<8x1xf32>
    %86 = vector.broadcast %85 : vector<8x1xf32> to vector<8x8xf32>
    %87 = arith.mulf %82, %86 : vector<8x8xf32>
    %cst_40 = arith.constant dense<0.000000e+00> : vector<8x8xf32>
    %88 = tpu.matmul %87, %74, %cst_40 {dimension_numbers = #tpu.dot_dimension_numbers<[1], [0], [0], [1], [0, 0, 1, 1], [], []>} : vector<8x8xf32>, vector<8x8xf32>, vector<8x8xf32> -> vector<8x8xf32>
    %c24 = arith.constant 24 : index
    %c0_41 = arith.constant 0 : index
    %89 = vector.load %arg9[%c24, %c0_41] : memref<32x32xf32, #tpu.memory_space<vmem>>, vector<8x32xf32>
    %cst_42 = arith.constant dense<0.000000e+00> : vector<8x32xf32>
    %90 = tpu.matmul %88, %89, %cst_42 {dimension_numbers = #tpu.dot_dimension_numbers<[1], [0], [0], [1], [0, 0, 1, 1], [], []>} : vector<8x8xf32>, vector<8x32xf32>, vector<8x32xf32> -> vector<8x32xf32>
    %91 = arith.addf %71, %90 : vector<8x32xf32>
    %c0_43 = arith.constant 0 : index
    %c0_44 = arith.constant 0 : index
    %92 = vector.load %arg10[%c0_43, %c0_44] : memref<1x32xf32, #tpu.memory_space<vmem>>, vector<1x32xf32>
    %93 = vector.broadcast %92 : vector<1x32xf32> to vector<8x32xf32>
    %94 = arith.addf %91, %93 : vector<8x32xf32>
    %c0_45 = arith.constant 0 : index
    %c0_46 = arith.constant 0 : index
    %c0_47 = arith.constant 0 : index
    %95 = vector.load %arg11[%c0_45, %c0_46, %c0_47] : memref<1x8x32xf32, #tpu.memory_space<vmem>>, vector<1x8x32xf32>
    %96 = vector.shape_cast %95 : vector<1x8x32xf32> to vector<8x32xf32>
    %97 = vector.shape_cast %94 : vector<8x32xf32> to vector<1x8x32xf32>
    tpu.vector_store %arg11[%c0_45, %c0_46, %c0_47], %97 {strides = array<i32>} : memref<1x8x32xf32, #tpu.memory_space<vmem>>, vector<1x8x32xf32>,
    return
  }
  func.func @transform_0(%arg0: i32, %arg1: i32) -> (i32, i32, i32) {
    %c0_i32 = arith.constant 0 : i32
    %c0_i32_0 = arith.constant 0 : i32
    return %arg0, %arg1, %c0_i32 : i32, i32, i32
  }
  func.func @transform_1(%arg0: i32, %arg1: i32) -> (i32, i32, i32) {
    %c0_i32 = arith.constant 0 : i32
    %c0_i32_0 = arith.constant 0 : i32
    %c0_i32_1 = arith.constant 0 : i32
    return %arg0, %c0_i32, %c0_i32_0 : i32, i32, i32
  }
  func.func @transform_2(%arg0: i32, %arg1: i32) -> (i32, i32, i32) {
    %c0_i32 = arith.constant 0 : i32
    %c0_i32_0 = arith.constant 0 : i32
    %c0_i32_1 = arith.constant 0 : i32
    return %arg0, %c0_i32, %c0_i32_0 : i32, i32, i32
  }
  func.func @transform_3(%arg0: i32, %arg1: i32) -> (i32, i32, i32, i32) {
    %c0_i32 = arith.constant 0 : i32
    %c0_i32_0 = arith.constant 0 : i32
    %c0_i32_1 = arith.constant 0 : i32
    return %arg0, %c0_i32, %arg1, %c0_i32_0 : i32, i32, i32, i32
  }
  func.func @transform_4(%arg0: i32, %arg1: i32) -> (i32, i32) {
    %c0_i32 = arith.constant 0 : i32
    %c0_i32_0 = arith.constant 0 : i32
    %c0_i32_1 = arith.constant 0 : i32
    return %c0_i32, %c0_i32_0 : i32, i32
  }
  func.func @transform_5(%arg0: i32, %arg1: i32) -> (i32, i32) {
    %c0_i32 = arith.constant 0 : i32
    %c0_i32_0 = arith.constant 0 : i32
    %c0_i32_1 = arith.constant 0 : i32
    return %c0_i32, %c0_i32_0 : i32, i32
  }
  func.func @transform_6(%arg0: i32, %arg1: i32) -> (i32, i32) {
    %c0_i32 = arith.constant 0 : i32
    %c0_i32_0 = arith.constant 0 : i32
    %c0_i32_1 = arith.constant 0 : i32
    return %c0_i32, %c0_i32_0 : i32, i32
  }
  func.func @transform_7(%arg0: i32, %arg1: i32) -> (i32, i32) {
    %c0_i32 = arith.constant 0 : i32
    %c0_i32_0 = arith.constant 0 : i32
    %c0_i32_1 = arith.constant 0 : i32
    return %c0_i32, %c0_i32_0 : i32, i32
  }
  func.func @transform_8(%arg0: i32, %arg1: i32) -> (i32, i32) {
    %c0_i32 = arith.constant 0 : i32
    %c0_i32_0 = arith.constant 0 : i32
    %c0_i32_1 = arith.constant 0 : i32
    return %c0_i32, %c0_i32_0 : i32, i32
  }
  func.func @transform_9(%arg0: i32, %arg1: i32) -> (i32, i32, i32) {
    %c0_i32 = arith.constant 0 : i32
    %c0_i32_0 = arith.constant 0 : i32
    return %arg0, %arg1, %c0_i32 : i32, i32, i32
  }
}

</mosaic_0001>

<bundles_post_ra>
// kernel: tpu_custom_call.1
= control target key start
LH: loop header
LB: loop body
LE: loop exit
PB: predicated region body
PF: predicated region fallthrough
CT: control target
= control target key end

     0   :  { %s3055_s0 = inlined_call_operand.hbm [shape: f32[2,8,32], index: 0, kind: input, shape index: {}]   ;;  %s3056_s1 = inlined_call_operand.hbm [shape: f32[2,8,32], index: 1, kind: input, shape index: {}]   ;;  %s3057_s2 = inlined_call_operand.hbm [shape: f32[2,8,32], index: 2, kind: input, shape index: {}]   ;;  %s3058_s3 = inlined_call_operand.hbm [shape: f32[2,1,8,8], index: 3, kind: input, shape index: {}]   ;;  %s3059_s4 = inlined_call_operand.hbm [shape: f32[32,32], index: 4, kind: input, shape index: {}]   ;;  %s3060_s5 = inlined_call_operand.hbm [shape: f32[32,32], index: 5, kind: input, shape index: {}]   ;;  %s3061_s6 = inlined_call_operand.hbm [shape: f32[32,32], index: 6, kind: input, shape index: {}]   ;;  %s3062_s7 = inlined_call_operand.hbm [shape: f32[32,32], index: 7, kind: input, shape index: {}]   ;;  %s3063_s8 = inlined_call_operand.vmem [shape: f32[1,32], index: 8, kind: input, shape index: {}]   ;;  %s3064_s9 = inlined_call_operand.hbm [shape: f32[2,8,32], index: 9, kind: output, shape index: {}]  }
   0x1   :  { %3080 = sst [smem:[#allocation31_spill]] %s3056_s1 }
   0x2   :  { %3081 = sst [smem:[#allocation32_spill]] %s3059_s4 }
   0x3   :  { %3082 = sst [smem:[#allocation33_spill]] %s3060_s5 }
   0x4   :  { %3083 = sst [smem:[#allocation34_spill]] %s3061_s6 }
   0x5   :  { %3084 = sst [smem:[#allocation35_spill]] %s3064_s9 }
   0x6   :  { %14 = vsyncpa [#allocation5], 0 }
   0x7   :  { %16 = vsyncpa [#allocation5 + $0x1], 0 }
   0x8   :  { %17 = vsyncpa [#allocation8], 0 }
   0x9   :  { %19 = vsyncpa [#allocation8 + $0x1], 0 }
   0xa   :  { %20 = vsyncpa [#allocation11], 0 }
   0xb   :  { %22 = vsyncpa [#allocation11 + $0x1], 0 }
   0xc   :  { %23 = vsyncpa [#allocation14], 0 }
   0xd   :  { %24 = vsyncpa [#allocation17], 0 }
   0xe   :  { %25 = vsyncpa [#allocation6], 0 }
   0xf   :  { %27 = vsyncpa [#allocation6 + $0x1], 0  ;;  %s2655_s30 = smov 0   ;;  %s2657_s10 = smov 0  }
  0x10   :  { %s2659_s11 = smov 0   ;;  %s2661_s12 = smov 0  }
  0x11   :  { %s2663_s13 = smov 0   ;;  %s2665_s14 = smov 0  }
  0x12 LB: > { %3085 = sst [smem:[#allocation26_spill]] %s2567_s30  ;;  %s2686_s15 = sadd.s32 4294967295, %s2587_s14   ;;  %s2587_s14 = sphi %s2665_s14, %s33_s14   ;;  %s2583_s13 = sphi %s2663_s13, %s3123_s13   ;;  %s2579_s12 = sphi %s2661_s12, %s3122_s12   ;;  %s2575_s11 = sphi %s2659_s11, %s3126_s11   ;;  %s2571_s10 = sphi %s2657_s10, %s3125_s10   ;;  %s2567_s30 = sphi %s2655_s30, %s3124_s30  }
  0x13   : > { %3086 = sst [smem:[#allocation27_spill]] %s2583_s13  ;;  %s1949_s16 = sadd.s32 4294967294, %s2587_s14  }
  0x14   : > { %p67_p0 = scmp.ne.s32.totalorder %s2571_s10, %s2567_s30  ;;  %p3065_p1 = scmp.eq.s32.totalorder %s2686_s15, 0 }
  0x15   : > { %p278_p2 = scmp.eq.s32.totalorder %s2686_s15, 1  ;;  %p284_p3 = scmp.eq.s32.totalorder %s1949_s16, 1 }
  0x16   : > { %p2695_p4 = por %p3065_p1, %p67_p0  ;;  %p1950_p5 = scmp.ge.s32.totalorder %s2587_s14, 1 }
  0x17   : > { %p2700_p6 = por %p284_p3, %p67_p0  ;;  %p291_p7 = scmp.lt.s32.totalorder %s2587_s14, 3 }
  0x18   : > { %s2589_s20 = smov [#allocation12]   ;;  %s2590_s23 = smov [#allocation13]  }
  0x19   : > { %s3088_s18 = scalar_select %p2700_p6, 1, 0 }
  0x1a   : > { %p2705_p8 = pnand %p1950_p5, %p291_p7  ;;  %s303_s21 = sshll.u32 %s2589_s20, 4  ;;  %s304_s21 = int_to_ptr.vmem [resolvable:$true] %s303_s21 }
  0x1b   : > { %3089 = sst [smem:[#allocation28_spill]] %s3088_s18  ;;  %s316_s24 = sshll.u32 %s2590_s23, 4  ;;  %s317_s24 = int_to_ptr.vmem [resolvable:$true] %s316_s24 }
  0x1c   : > { %p2156_p9 = pneg %p2705_p8  ;;  %s2282_s25 = scalar_lea.vmem %s304_s21, 512 }
  0x1d   : > { %p2283_p13 = scmp.ne.s32.totalorder %s304_s21, %s2282_s25  ;;  %p2290_p5 = scmp.lt.s32.totalorder %s304_s21, %s304_s21 }
  0x1e   : > { %p2714_p11 = pnand %p2156_p9, %p3065_p1  ;;  %p2291_p7 = scmp.lt.s32.totalorder %s2282_s25, %s2282_s25 }
  0x20   : > { %p3075_p12 = pneg %p2714_p11  ;;  %p2292_p10 = por %p2291_p7, %p2290_p5 }
  0x22   : > { %p2285_p0 = pnand %p2283_p13, %p3075_p12 }
  0x24   : > { %p2286_p3 = pneg %p2285_p0 }
  0x26   : > { %p2293_p9 = pnand %p2292_p10, %p2286_p3 }
  0x28   : > { %2296 = shalt.err (!%p2293_p9)
}
  0x29   : > { %s3066_s26 = smov 128   ;;  %s3068_s27 = smov 8  }
  0x2a   : > { %s3092_s4 = sld [smem:[#allocation32_spill]]  ;;  %s2308_s16 = scalar_lea.vmem %s317_s24, 512 }
  0x2b   : > { %p2309_p13 = scmp.ne.s32.totalorder %s317_s24, %s2308_s16  ;;  %p2316_p10 = scmp.lt.s32.totalorder %s317_s24, %s317_s24 }
  0x2c   : > { %p2317_p3 = scmp.lt.s32.totalorder %s2308_s16, %s2308_s16 }
  0x2d   : > { %p2311_p0 = pnand %p2309_p13, %p3075_p12 }
  0x2e   : > { %p2318_p7 = por %p2317_p3, %p2316_p10 }
  0x2f   : > { %p2312_p5 = pneg %p2311_p0 }
  0x30   : > { %2159 = dma.hbm_to_vmem [thread:$0]  (!%p2714_p11), %s3092_s4, 512, %s304_s21, [#allocation11], %s3066_s26, %s3066_s26, %s3068_s27  }
  0x31   : > { %p2319_p9 = pnand %p2318_p7, %p2312_p5 }
  0x33   : > { %2322 = shalt.err (!%p2319_p9)
}
  0x34   : > { %s3093_s5 = sld [smem:[#allocation33_spill]]  ;;  %s45_s21 = sadd.s32 1, %s2583_s13 }
  0x35   : > { %s54_s25 = sadd.s32 1, %s2575_s11  ;;  %p47_p13 = scmp.ge.s32.totalorder %s45_s21, 2 }
  0x36   : > { %p61_p0 = scmp.ne.s32.totalorder %s2575_s11, %s2571_s10  ;;  %p62_p5 = scmp.eq.s32.totalorder %s2587_s14, 0 }
  0x37   : > { %p2190_p10 = scmp.lt.s32.totalorder %s2587_s14, 2  ;;  %s3128_s21 = smov (%p47_p13, %s45_s21), 0 }
  0x38   : > { %3094 = sst [smem:[#allocation29_spill]] %s3128_s21  ;;  %p63_p3 = por %p62_p5, %p61_p0 }
  0x39   : > { %p2752_p7 = por %p278_p2, %p61_p0  ;;  %s49_s29 = ssub.s32 %s2583_s13, %s3128_s21 }
  0x3a   : > { %2162 = dma.hbm_to_vmem [thread:$0]  (!%p2714_p11), %s3093_s5, 512, %s317_s24, [#allocation14], %s3066_s26, %s3066_s26, %s3068_s27  }
  0x3b   : > { %s3095_s28 = scalar_select %p2752_p7, 1, 0 }
  0x3c   : > { %s3071_s24 = sand.u32 1, %s2575_s11   ;;  %p52_p9 = scmp.eq.s32.totalorder %s49_s29, 0 }
  0x3d   : > { %s2761_s16 = sshll.u32 %s3071_s24, 3  ;;  %s2764_s20 = sshll.u32 %s2583_s13, 7 }
  0x3e   : > { %p2766_p1 = pnand %p2190_p10, %p63_p3  ;;  %s3076_s27 = sand.u32 1, %s2587_s14  }
  0x3f   : > { %s2771_s26 = scalar_select %p52_p9, %s2575_s11, %s54_s25  }
  0x40   : > { %s3098_s1 = sld [smem:[#allocation31_spill]]  ;;  %s382_s21 = scalar_lea.vmem [#allocation7], %s2761_s16 }
  0x41   : > { %3097 = sst [smem:[#allocation30_spill]] %s2771_s26  ;;  %s389_s24 = sshll.u32 %s382_s21, 4  ;;  %s390_s24 = int_to_ptr.vmem [resolvable:$true] %s389_s24 }
  0x42   : > { %s2781_s13 = scalar_lea.sflag [#allocation8], %s3076_s27  ;;  %p3077_p2 = pneg %p2766_p1 }
  0x43   : > { %s2336_s18 = scalar_lea.vmem %s390_s24, 128  ;;  %s2593_s25 = smov [#allocation7]  }
  0x44   : > { %p2337_p13 = scmp.ne.s32.totalorder %s390_s24, %s2336_s18  ;;  %s2341_s26 = sshll.u32 %s2593_s25, 4  ;;  %s2342_s26 = int_to_ptr.vmem [resolvable:$false] %s2341_s26 }
  0x45   : > { %s2343_s30 = scalar_lea.vmem %s2342_s26, 256  ;;  %p2344_p10 = scmp.lt.s32.totalorder %s390_s24, %s2342_s26 }
  0x46   : > { %s387_s29 = scalar_lea.hbm %s3098_s1, %s2764_s20  ;;  %p2339_p0 = pnand %p2337_p13, %p3077_p2 }
  0x47   : > { %p2345_p3 = scmp.lt.s32.totalorder %s2343_s30, %s2336_s18 }
  0x48   : > { %p2340_p5 = pneg %p2339_p0 }
  0x49   : > { %p2346_p9 = por %p2345_p3, %p2344_p10 }
  0x4b   : > { %p2347_p12 = pnand %p2346_p9, %p2340_p5 }
  0x4d   : > { %2350 = shalt.err (!%p2347_p12)
}
  0x4e   : > { %2175 = dma.hbm_to_vmem [thread:$0]  (!%p2766_p1), %s387_s29, 128, %s390_s24, %s2781_s13  }
  0x4f   : > { %s2594_s4 = smov [#allocation15]   ;;  %s2595_s21 = smov [#allocation16]  }
  0x50   : > { %s329_s5 = sshll.u32 %s2594_s4, 4  ;;  %s342_s27 = sshll.u32 %s2595_s21, 4  ;;  %s330_s5 = int_to_ptr.vmem [resolvable:$true] %s329_s5  ;;  %s343_s27 = int_to_ptr.vmem [resolvable:$true] %s342_s27 }
  0x51   : > { %s2362_s1 = scalar_lea.vmem %s330_s5, 512  ;;  %p3099_p0 = pneg %p2714_p11 }
  0x52   : > { %p2363_p13 = scmp.ne.s32.totalorder %s330_s5, %s2362_s1  ;;  %p2370_p10 = scmp.lt.s32.totalorder %s330_s5, %s330_s5 }
  0x53   : > { %p2371_p5 = scmp.lt.s32.totalorder %s2362_s1, %s2362_s1 }
  0x54   : > { %p2365_p2 = pnand %p2363_p13, %p3099_p0 }
  0x55   : > { %p2372_p12 = por %p2371_p5, %p2370_p10 }
  0x56   : > { %p2366_p6 = pneg %p2365_p2 }
  0x58   : > { %p2373_p3 = pnand %p2372_p12, %p2366_p6 }
  0x5a   : > { %2376 = shalt.err (!%p2373_p3)
}
  0x5b   : > { %s3100_s30 = smov 8   ;;  %s3101_s18 = smov 128  }
  0x5c   : > { %s3102_s6 = sld [smem:[#allocation34_spill]]  ;;  %s2388_s29 = scalar_lea.vmem %s343_s27, 512 }
  0x5d   : > { %p2389_p9 = scmp.ne.s32.totalorder %s343_s27, %s2388_s29  ;;  %p3103_p13 = pmov %p3099_p0 }
  0x5e   : > { %p2396_p7 = scmp.lt.s32.totalorder %s343_s27, %s343_s27  ;;  %p2397_p10 = scmp.lt.s32.totalorder %s2388_s29, %s2388_s29 }
  0x5f   : > { %p2391_p2 = pnand %p2389_p9, %p3103_p13 }
  0x60   : > { %p2398_p6 = por %p2397_p10, %p2396_p7 }
  0x61   : > { %p2392_p0 = pneg %p2391_p2 }
  0x62   : > { %2165 = dma.hbm_to_vmem [thread:$0]  (!%p2714_p11), %s3102_s6, 512, %s330_s5, [#allocation14], %s3101_s18, %s3101_s18, %s3100_s30  }
  0x63   : > { %p2399_p5 = pnand %p2398_p6, %p2392_p0 }
  0x65   : > { %2402 = shalt.err (!%p2399_p5)
}
  0x66   : > { %2168 = dma.hbm_to_vmem [thread:$0]  (!%p2714_p11), %s3062_s7, 512, %s343_s27, [#allocation17], %s3101_s18, %s3101_s18, %s3100_s30  }
  0x67   : > { %s369_s21 = scalar_lea.hbm %s3055_s0, %s2764_s20  ;;  %s363_s26 = scalar_lea.vmem [#allocation4], %s2761_s16 }
  0x68   : > { %s371_s24 = sshll.u32 %s363_s26, 4  ;;  %s3104_s29 = sand.u32 1, %s2575_s11   ;;  %s372_s24 = int_to_ptr.vmem [resolvable:$true] %s371_s24 }
  0x69   : > { %s360_s22 = scalar_lea.sflag [#allocation5], %s3104_s29  ;;  %s2416_s6 = scalar_lea.vmem %s372_s24, 128 }
  0x6a   : > { %p2417_p7 = scmp.ne.s32.totalorder %s372_s24, %s2416_s6  ;;  %p3105_p12 = pneg %p2766_p1 }
  0x6b   : > { %s2596_s1 = smov [#allocation4]  }
  0x6c   : > { %p2419_p3 = pnand %p2417_p7, %p3105_p12  ;;  %s2421_s25 = sshll.u32 %s2596_s1, 4  ;;  %s2422_s25 = int_to_ptr.vmem [resolvable:$false] %s2421_s25 }
  0x6d   : > { %s2423_s9 = scalar_lea.vmem %s2422_s25, 256  ;;  %p2424_p11 = scmp.lt.s32.totalorder %s372_s24, %s2422_s25 }
  0x6e   : > { %p2420_p9 = pneg %p2419_p3  ;;  %p2425_p13 = scmp.lt.s32.totalorder %s2423_s9, %s2416_s6 }
  0x70   : > { %p2426_p2 = por %p2425_p13, %p2424_p11 }
  0x72   : > { %p2427_p0 = pnand %p2426_p2, %p2420_p9 }
  0x74   : > { %2430 = shalt.err (!%p2427_p0)
}
  0x75   : > { %2172 = dma.hbm_to_vmem [thread:$0]  (!%p2766_p1), %s369_s21, 128, %s372_s24, %s360_s22  }
  0x76   : > { %s405_s18 = scalar_lea.hbm %s3057_s2, %s2764_s20  ;;  %s400_s4 = scalar_lea.vmem [#allocation9], %s2761_s16 }
  0x77   : > { %s407_s5 = sshll.u32 %s400_s4, 4  ;;  %p3106_p6 = pmov %p3105_p12  ;;  %s408_s5 = int_to_ptr.vmem [resolvable:$true] %s407_s5 }
  0x78   : > { %s2444_s26 = scalar_lea.vmem %s408_s5, 128  ;;  %s2597_s6 = smov [#allocation9]  }
  0x79   : > { %p2445_p10 = scmp.ne.s32.totalorder %s408_s5, %s2444_s26  ;;  %s2449_s9 = sshll.u32 %s2597_s6, 4  ;;  %s2450_s9 = int_to_ptr.vmem [resolvable:$false] %s2449_s9 }
  0x7a   : > { %s2451_s29 = scalar_lea.vmem %s2450_s9, 256  ;;  %p2452_p12 = scmp.lt.s32.totalorder %s408_s5, %s2450_s9 }
  0x7b   : > { %p2447_p5 = pnand %p2445_p10, %p3106_p6  ;;  %p2453_p3 = scmp.lt.s32.totalorder %s2451_s29, %s2444_s26 }
  0x7d   : > { %p2448_p7 = pneg %p2447_p5  ;;  %p2454_p9 = por %p2453_p3, %p2452_p12 }
  0x7f   : > { %p2455_p11 = pnand %p2454_p9, %p2448_p7 }
  0x81   : > { %2458 = shalt.err (!%p2455_p11)
}
  0x82   : > { %2178 = dma.hbm_to_vmem [thread:$0]  (!%p2766_p1), %s405_s18, 128, %s408_s5, %s2781_s13  }
  0x83   : > { %s424_s22 = scalar_lea.hbm %s3058_s3, %s2764_s20  ;;  %s418_s1 = scalar_lea.vmem [#allocation10], %s2761_s16 }
  0x84   : > { %s426_s25 = sshll.u32 %s418_s1, 4  ;;  %s3107_s27 = sand.u32 1, %s2587_s14   ;;  %s427_s25 = int_to_ptr.vmem [resolvable:$true] %s426_s25 }
  0x85   : > { %s415_s30 = scalar_lea.sflag [#allocation11], %s3107_s27  ;;  %s2472_s4 = scalar_lea.vmem %s427_s25, 128 }
  0x86   : > { %p2473_p13 = scmp.ne.s32.totalorder %s427_s25, %s2472_s4  ;;  %p3108_p2 = pmov %p3106_p6 }
  0x87   : > { %s2598_s26 = smov [#allocation10]  }
  0x88   : > { %p2475_p0 = pnand %p2473_p13, %p3108_p2  ;;  %s2477_s6 = sshll.u32 %s2598_s26, 4  ;;  %s2478_s6 = int_to_ptr.vmem [resolvable:$false] %s2477_s6 }
  0x89   : > { %s2479_s9 = scalar_lea.vmem %s2478_s6, 256  ;;  %p2480_p6 = scmp.lt.s32.totalorder %s427_s25, %s2478_s6 }
  0x8a   : > { %p2476_p10 = pneg %p2475_p0  ;;  %p2481_p5 = scmp.lt.s32.totalorder %s2479_s9, %s2472_s4 }
  0x8c   : > { %p2482_p7 = por %p2481_p5, %p2480_p6 }
  0x8e   : > { %p2483_p12 = pnand %p2482_p7, %p2476_p10 }
  0x90   : > { %2486 = shalt.err (!%p2483_p12)
}
  0x91   : > { %2181 = dma.hbm_to_vmem [thread:$0]  (!%p2766_p1), %s424_s22, 128, %s427_s25, %s415_s30  }
  0x92   : > { %435 = sbr.rel (%p2705_p8) target bundleno = 2619 (0xa3b), region = 56  ;;  %s2851_s13 = sand.u32 (!%p2705_p8), 1, %s2571_s10  }
  0x93   : > { %s2854_s16 = sshll.u32 (!%p2705_p8), %s2851_s13, 3  ;;  %s438_s20 = scalar_lea.sflag (!%p2705_p8), [#allocation5], %s2851_s13 }
  0x94   : > { %s441_s18 = scalar_lea.vmem (!%p2705_p8), [#allocation4], %s2854_s16 }
  0x97   : > { %2538 = dma.done.wait (%p2695_p4), %s438_s20, 128  }
  0x98   : > { %2540 = vsyncadd (%p2695_p4), %s438_s20, 4294967168  ;;  %s446_s19 = sand.u32 1, %s2686_s15   ;;  %s450_s5 = scalar_lea.vmem [#allocation7], %s2854_s16 }
  0x99   : > { %s447_s23 = scalar_lea.sflag [#allocation8], %s446_s19 }
  0x9a   : > { %2542 = dma.done.wait (%p2695_p4), %s447_s23, 256  }
  0x9b   : > { %2544 = vsyncadd (%p2695_p4), %s447_s23, 4294967040  ;;  %s459_s29 = scalar_lea.vmem [#allocation9], %s2854_s16  ;;  %s465_s21 = scalar_lea.sflag [#allocation11], %s446_s19 }
  0x9c   : > { %s468_s24 = scalar_lea.vmem [#allocation10], %s2854_s16 }
  0x9d   : > { %2546 = dma.done.wait (%p2695_p4), %s465_s21, 128  }
  0x9e   : > { %2548 = vsyncadd (%p2695_p4), %s465_s21, 4294967168  ;;  %p3109_p1 = scmp.eq.s32.totalorder %s2686_s15, 0 }
  0xa0   : > { %2550 = dma.done.wait (%p3109_p1), [#allocation11], 512   ;;  %p3110_p8 = pmov %p3109_p1 }
  0xa1   : > { %p3111_p3 = pmov %p3109_p1 }
  0xa2   : > { %2552 = vsyncadd (%p3110_p8), [#allocation11], 4294966784 }
  0xa3   : > { %2554 = dma.done.wait (%p3111_p3), [#allocation14], 1024   ;;  %p3112_p9 = pmov %p3109_p1 }
  0xa4   : > { %p3113_p11 = pmov %p3109_p1 }
  0xa5   : > { %2556 = vsyncadd (%p3112_p9), [#allocation14], 4294966272 }
  0xa6   : > { %2558 = dma.done.wait (%p3113_p11), [#allocation17], 512   ;;  %p3114_p13 = pmov %p3109_p1 }
  0xa7   : > { %v2599_v0 = vmov 0.0   ;;  %vm2600_vm0 = vmmov 0   ;;  %v543_v1 = vld [vmem:[#allocation13 + $0x18] sm:$0xff]  ;;  %v542_v2 = vld [vmem:[#allocation13 + $0x10] sm:$0xff]  ;;  %v541_v3 = vld [vmem:[#allocation13 + $0x8] sm:$0xff]  ;;  %vm544_vm1 = vcmask 261120  }
  0xa8   : > { %2560 = vsyncadd (%p3114_p13), [#allocation17], 4294966784  ;;  %2037 = vmatprep.subr.mxu0 %v2599_v0  ;;  %2045 = vmatprep.mubr.msk.f32.mxu0 %vm2600_vm0, %v2599_v0  ;;  %v540_v4 = vld [vmem:[#allocation13] sm:$0xff]  ;;  %v538_v5 = vld [vmem:[%s450_s5] sm:$0xff]  ;;  %vm780_vm2 = vcmask 64512   ;;  %s2601_s15 = smov 120  }
  0xa9   : > { %2048 = vmatprep.subr.mxu1 %v2599_v0  ;;  %2056 = vmatprep.mubr.msk.f32.mxu1 %vm2600_vm0, %v2599_v0  ;;  %v701_v6 = vld [vmem:[#allocation12 + $0x18] sm:$0xff]  ;;  %v700_v7 = vld [vmem:[#allocation12 + $0x10] sm:$0xff]  ;;  %v699_v8 = vld [vmem:[#allocation12 + $0x8] sm:$0xff]  ;;  %s2602_s17 = smov 112   ;;  %s2603_s22 = smov 104  }
  0xaa   : > { %2038 = vmatpush3.msra.mxu0 %v543_v1  ;;  %v698_v9 = vld [vmem:[#allocation12] sm:$0xff]  ;;  %v622_v11 = vld [vmem:[#allocation15 + $0x18] sm:$0xff]  ;;  %v621_v12 = vld [vmem:[#allocation15 + $0x10] sm:$0xff]  ;;  %s1995_s27 = sshll.u32 %s2579_s12, 7  ;;  %s533_s30 = scalar_lea.vmem [#allocation18], %s2854_s16 }
  0xab   : > { %2039 = vmatprep.subr.mxu0 %v2599_v0  ;;  %v697_v10 = vld [vmem:[%s441_s18] sm:$0xff]  ;;  %2049 = vmatpush3.msra.mxu1 %v622_v11  ;;  %v2945_v26 = vld [vmem:[%s468_s24] sm:$0xff]  ;;  %s1763_s4 = sshll.u32 %s533_s30, 4  ;;  %s3115_s9 = sld [smem:[#allocation35_spill]]  ;;  %s1764_s4 = int_to_ptr.vmem [resolvable:$true] %s1763_s4 }
  0xac   : > { %2040 = vmatpush3.msra.mxu0 %v542_v2  ;;  %2050 = vmatprep.subr.mxu1 %v2599_v0  ;;  %v620_v13 = vld [vmem:[#allocation15 + $0x8] sm:$0xff]  ;;  %v619_v14 = vld [vmem:[#allocation15] sm:$0xff]  ;;  %vm779_vm3 = vcmp.eq.f32.partialorder %v2945_v26, 0.0  ;;  %s1749_s18 = scalar_lea.sflag [#allocation6], %s2851_s13  ;;  %s2487_s19 = scalar_lea.vmem %s1764_s4, 128 }
  0xad   : > { %2041 = vmatprep.subr.mxu0 %v2599_v0  ;;  %2051 = vmatpush3.msra.mxu1 %v621_v12  ;;  %v539_v15 = vld [vmem:[%s459_s29] sm:$0xff]  ;;  %p2488_p4 = scmp.ne.s32.totalorder %s1764_s4, %s2487_s19  ;;  %p3116_p2 = scmp.ne.s32.totalorder %s3095_s28, 0 }
  0xae   : > { %2042 = vmatpush3.msra.mxu0 %v541_v3  ;;  %2052 = vmatprep.subr.mxu1 %v2599_v0  ;;  %v1110_v48 = vld [vmem:[#allocation16 + $0x8] sm:$0xff]  ;;  %v942_v53 = vld [vmem:[#allocation16] sm:$0xff]  ;;  %s2604_s23 = smov [#allocation18]  }
  0xaf   : > { %2043 = vmatprep.subr.mxu0 %v2599_v0  ;;  %2053 = vmatpush3.msra.mxu1 %v620_v13  ;;  %p2489_p0 = pnand %p2488_p4, %p3116_p2  ;;  %s2491_s12 = sshll.u32 %s2604_s23, 4  ;;  %s2492_s12 = int_to_ptr.vmem [resolvable:$false] %s2491_s12 }
  0xb0   : > { %2044 = vmatpush3.msra.mxu0 %v540_v4  ;;  %2054 = vmatprep.subr.mxu1 %v2599_v0  ;;  %s2493_s16 = scalar_lea.vmem %s2492_s12, 256  ;;  %p2494_p6 = scmp.lt.s32.totalorder %s1764_s4, %s2492_s12 }
  0xb1   : > { %2046 = vmatmul.mubr.msk.f32.vlgmr.msra.gmra.mxu0 %vm544_vm1, %v538_v5  ;;  %2059 = vmatprep.subr.mxu0 %v2599_v0  ;;  %s1761_s20 = scalar_lea.hbm %s3115_s9, %s1995_s27  ;;  %p2490_p10 = pneg %p2489_p0 }
  0xb2   : > { %2060 = vmatpush3.msra.mxu0 %v701_v6  ;;  %2067 = vmatprep.mubr.msk.f32.mxu0 %vm2600_vm0, %v2599_v0  ;;  %p2495_p5 = scmp.lt.s32.totalorder %s2493_s16, %s2487_s19 }
  0xb3   : > { %2061 = vmatprep.subr.mxu0 %v2599_v0  ;;  %2055 = vmatpush3.msra.mxu1 %v619_v14 }
  0xb4   : > { %2062 = vmatpush3.msra.mxu0 %v700_v7  ;;  %2057 = vmatmul.mubr.msk.f32.vlgmr.msra.gmra.mxu1 %vm544_vm1, %v539_v15  ;;  %p2496_p7 = por %p2495_p5, %p2494_p6 }
  0xb5   : > { %2063 = vmatprep.subr.mxu0 %v2599_v0  ;;  %2070 = vmatprep.subr.mxu1 %v2599_v0 }
  0xb6   : > { %2064 = vmatpush3.msra.mxu0 %v699_v8  ;;  %2072 = vmatprep.mubr.msk.f32.mxu1 %vm2600_vm0, %v2599_v0  ;;  %p2497_p12 = pnand %p2496_p7, %p2490_p10 }
  0xb7   : > { %2065 = vmatprep.subr.mxu0 %v2599_v0 }
  0xb8   : > { %2066 = vmatpush3.msra.mxu0 %v698_v9 }
  0xb9   : > { %2068 = vmatmul.mubr.msk.f32.vlgmr.msra.gmra.mxu0 %vm544_vm1, %v697_v10  ;;  %2080 = vmatprep.subr.mxu0 %v2599_v0 }
  0xba   : > { %2082 = vmatprep.mubr.msk.f32.mxu0 %vm2600_vm0, %v2599_v0 }
 0x171   : > { %v614_v16 = vpop.f32.mrf.mxu0 }
 0x172   : > { %618 = vst.msk [vmem:[#allocation2] sm:$0xff] %vm544_vm1, %v614_v16  ;;  %v1423_v16 = vld [vmem:[#allocation16 + $0x10] sm:$0xff] }
 0x173   : > { %v2047_v17 = vpop.f32.mrf.mxu0 }
 0x174   : > { %v692_v21 = vpop.f32.mrf.mxu1 }
 0x175   : > { %696 = vst.msk [vmem:[#allocation3] sm:$0xff] %vm544_vm1, %v692_v21 }
 0x176   : > { %v2058_v22 = vpop.f32.mrf.mxu1 }
 0x179   : > { %v2918_v18 = vld [vmem:[#allocation2] sm:$0xff]  ;;  %v2920_v19 = vpop.f32.mrf.mxu0 }
 0x17a   : > { %945 = vrot.lane.b32.xlu0 %v2918_v18, %s2601_s15  ;;  %2071 = vmatpush3.xpose.msk.msra.mxu1 %vm780_vm2, %v2918_v18 }
 0x17b   : > { %v2069_v20 = vpop.f32.mrf.mxu0  ;;  %2075 = vmatprep.subr.mxu1 %v2599_v0 }
 0x17c   : > { %v2939_v25 = vld [vmem:[#allocation3] sm:$0xff] }
 0x17d   : > { %2073 = vmatmul.mubr.msk.f32.vlgmr.msra.gmra.mxu1 %vm780_vm2, %v2920_v19 }
 0x17e   : > { %943 = vrot.lane.b32.xlu0 %v2920_v19, %s2601_s15  ;;  %2077 = vmatprep.mubr.msk.f32.mxu1 %vm2600_vm0, %v2599_v0 }
 0x17f   : > { %2076 = vmatpush3.msra.mxu1 %v2939_v25 }
 0x180   : > { %2085 = vmatprep.subr.mxu1 %v2599_v0 }
 0x1ec   : > { %v946_v23 = vpop.permute.xlu0 %945 }
 0x1ed   : > { %2081 = vmatpush3.xpose.msk.msra.mxu0 %vm780_vm2, %v946_v23 }
 0x1ee   : > { %2090 = vmatprep.subr.mxu0 %v2599_v0 }
 0x1f0   : > { %v944_v24 = vpop.permute.xlu0 %943 }
 0x1f1   : > { %2083 = vmatmul.mubr.msk.f32.vlgmr.msra.gmra.mxu0 %vm780_vm2, %v944_v24 }
 0x1f2   : > { %2092 = vmatprep.mubr.msk.f32.mxu0 %vm2600_vm0, %v2599_v0  ;;  %2091 = vmatpush3.msra.mxu0 %v1110_v48 }
 0x1f3   : > { %2100 = vmatprep.subr.mxu0 %v2599_v0 }
 0x23d   : > { %v853_v27 = vpop.f32.mrf.mxu1 }
 0x23e   : > { %v857_v28 = vsel %vm779_vm3, -1e+20, %v853_v27 }
 0x23f   : > { %v2074_v29 = vpop.f32.mrf.mxu1  ;;  %v858_v30 = vsel %vm780_vm2, %v857_v28, -inf }
 0x240   : > { %859 = vmax.xlane.f32.xlu1 %v858_v30 }
 0x2b1   : > { %v1017_v31 = vpop.f32.mrf.mxu0 }
 0x2b2   : > { %v1021_v32 = vsel %vm779_vm3, -1e+20, %v1017_v31 }
 0x2b3   : > { %v2084_v33 = vpop.f32.mrf.mxu0  ;;  %v1022_v34 = vsel %vm780_vm2, %v1021_v32, -inf }
 0x2b4   : > { %1023 = vmax.xlane.f32.xlu1 %v1022_v34 }
 0x2c9   : > { %v860_v35 = vpop.xlane.xlu1 %859 }
 0x2ca   : > { %v861_v36 = vsub.f32 %v857_v28, %v860_v35 }
 0x2cc   : > { %v862_v37 = vmul.f32 1.442695, %v861_v36 }
 0x2ce   : > { %2255 = vpow2.f32 %v862_v37 }
 0x2db   : > { %v2256_v38 = vpop.eup %2255 }
 0x2dc   : > { %v864_v39 = vsel %vm780_vm2, %v2256_v38, 0.0 }
 0x2dd   : > { %865 = vadd.xlane.f32.xlu0 %v864_v39  ;;  %v1993_v39 = vld [vmem:[%s3063_s8] ss:$0 sm:$0xff] }
 0x2f3   : > { %1347 = vrot.lane.b32.xlu0 %v2939_v25, %s2602_s17 }
 0x33d   : > { %v1024_v40 = vpop.xlane.xlu1 %1023 }
 0x33e   : > { %v1025_v41 = vsub.f32 %v1021_v32, %v1024_v40 }
 0x340   : > { %v1026_v42 = vmul.f32 1.442695, %v1025_v41 }
 0x342   : > { %2257 = vpow2.f32 %v1026_v42 }
 0x34f   : > { %v2258_v43 = vpop.eup %2257 }
 0x350   : > { %v1028_v44 = vsel %vm780_vm2, %v2258_v43, 0.0 }
 0x351   : > { %1029 = vadd.xlane.f32.xlu1 %v1028_v44 }
 0x362   : > { %1034 = vrot.lane.b32.xlu1 %v2939_v25, %s2601_s15 }
 0x366   : > { %v866_v45 = vpop.xlane.xlu0 %865  ;;  %1259 = vrot.lane.b32.xlu1 %v2918_v18, %s2602_s17 }
 0x367   : > { %2259 = vrcp.f32 %v866_v45 }
 0x36a   : > { %1257 = vrot.lane.b32.xlu1 %v2920_v19, %s2602_s17  ;;  %v1348_v55 = vpop.permute.xlu0 %1347 }
 0x374   : > { %v2260_v46 = vpop.eup %2259 }
 0x375   : > { %v868_v47 = vmul.f32 %v2260_v46, %v2256_v38 }
 0x377   : > { %2078 = vmatmul.mubr.msk.f32.vlgmr.msra.gmra.mxu1 %vm780_vm2, %v868_v47 }
 0x378   : > { %2087 = vmatprep.mubr.msk.f32.mxu1 %vm2600_vm0, %v2599_v0 }
 0x3da   : > { %v1030_v49 = vpop.xlane.xlu1 %1029 }
 0x3db   : > { %2261 = vrcp.f32 %v1030_v49 }
 0x3de   : > { %v1035_v50 = vpop.permute.xlu1 %1034 }
 0x3df   : > { %2086 = vmatpush3.msra.mxu1 %v1035_v50 }
 0x3e0   : > { %2095 = vmatprep.subr.mxu1 %v2599_v0 }
 0x3e2   : > { %v1260_v57 = vpop.permute.xlu1 %1259 }
 0x3e6   : > { %v1258_v60 = vpop.permute.xlu1 %1257 }
 0x3e8   : > { %v2262_v51 = vpop.eup %2261 }
 0x3e9   : > { %v1032_v52 = vmul.f32 %v2262_v51, %v2258_v43 }
 0x3eb   : > { %2088 = vmatmul.mubr.msk.f32.vlgmr.msra.gmra.mxu1 %vm780_vm2, %v1032_v52 }
 0x3ec   : > { %2096 = vmatpush3.msra.mxu1 %v942_v53  ;;  %2097 = vmatprep.mubr.msk.f32.mxu1 %vm2600_vm0, %v2599_v0 }
 0x3ed   : > { %2105 = vmatprep.subr.mxu1 %v2599_v0 }
 0x437   : > { %v938_v54 = vpop.f32.mrf.mxu1 }
 0x438   : > { %2098 = vmatmul.mubr.msk.f32.vlgmr.msra.gmra.mxu1 %vm780_vm2, %v938_v54 }
 0x439   : > { %2106 = vmatpush3.msra.mxu1 %v1348_v55  ;;  %v2079_v56 = vpop.f32.mrf.mxu1  ;;  %2107 = vmatprep.mubr.msk.f32.mxu1 %vm2600_vm0, %v2599_v0 }
 0x43a   : > { %2115 = vmatprep.subr.mxu1 %v2599_v0 }
 0x4ab   : > { %v1106_v58 = vpop.f32.mrf.mxu1 }
 0x4ac   : > { %2093 = vmatmul.mubr.msk.f32.vlgmr.msra.gmra.mxu0 %vm780_vm2, %v1106_v58 }
 0x4ad   : > { %2101 = vmatpush3.xpose.msk.msra.mxu0 %vm780_vm2, %v1260_v57  ;;  %v2089_v59 = vpop.f32.mrf.mxu1  ;;  %2102 = vmatprep.mubr.msk.f32.mxu0 %vm2600_vm0, %v2599_v0 }
 0x4ae   : > { %2110 = vmatprep.subr.mxu0 %v2599_v0 }
 0x4b0   : > { %2103 = vmatmul.mubr.msk.f32.vlgmr.msra.gmra.mxu0 %vm780_vm2, %v1258_v60 }
 0x4b1   : > { %2112 = vmatprep.mubr.msk.f32.mxu0 %vm2600_vm0, %v2599_v0  ;;  %2111 = vmatpush3.msra.mxu0 %v1423_v16 }
 0x4b2   : > { %2120 = vmatprep.subr.mxu0 %v2599_v0 }
 0x4f8   : > { %v1253_v61 = vpop.f32.mrf.mxu1 }
 0x4fa   : > { %v2099_v62 = vpop.f32.mrf.mxu1 }
 0x56c   : > { %v1180_v63 = vpop.f32.mrf.mxu0 }
 0x56d   : > { %v1254_v30 = vadd.f32 %v1253_v61, %v1180_v63 }
 0x56e   : > { %v2094_v1 = vpop.f32.mrf.mxu0 }
 0x570   : > { %v1331_v2 = vpop.f32.mrf.mxu0 }
 0x571   : > { %v1335_v3 = vsel %vm779_vm3, -1e+20, %v1331_v2 }
 0x572   : > { %v2104_v4 = vpop.f32.mrf.mxu0  ;;  %v1336_v5 = vsel %vm780_vm2, %v1335_v3, -inf }
 0x573   : > { %1337 = vmax.xlane.f32.xlu1 %v1336_v5 }
 0x5fc   : > { %v1338_v6 = vpop.xlane.xlu1 %1337 }
 0x5fd   : > { %v1339_v7 = vsub.f32 %v1335_v3, %v1338_v6 }
 0x5ff   : > { %v1340_v8 = vmul.f32 1.442695, %v1339_v7 }
 0x601   : > { %2263 = vpow2.f32 %v1340_v8 }
 0x60e   : > { %v2264_v9 = vpop.eup %2263 }
 0x60f   : > { %v1342_v10 = vsel %vm780_vm2, %v2264_v9, 0.0 }
 0x610   : > { %1343 = vadd.xlane.f32.xlu0 %v1342_v10 }
 0x626   : > { %1500 = vrot.lane.b32.xlu0 %v2918_v18, %s2603_s22 }
 0x62a   : > { %1498 = vrot.lane.b32.xlu0 %v2920_v19, %s2603_s22 }
 0x699   : > { %v1344_v11 = vpop.xlane.xlu0 %1343 }
 0x69a   : > { %2265 = vrcp.f32 %v1344_v11 }
 0x69d   : > { %v1501_v13 = vpop.permute.xlu0 %1500 }
 0x6a1   : > { %v1499_v15 = vpop.permute.xlu0 %1498 }
 0x6a7   : > { %v2266_v12 = vpop.eup %2265 }
 0x6a8   : > { %v1346_v14 = vmul.f32 %v2266_v12, %v2264_v9 }
 0x6aa   : > { %2108 = vmatmul.mubr.msk.f32.vlgmr.msra.gmra.mxu1 %vm780_vm2, %v1346_v14 }
 0x6ab   : > { %2116 = vmatpush3.xpose.msk.msra.mxu1 %vm780_vm2, %v1501_v13  ;;  %2117 = vmatprep.mubr.msk.f32.mxu1 %vm2600_vm0, %v2599_v0 }
 0x6ac   : > { %2125 = vmatprep.subr.mxu1 %v2599_v0 }
 0x6ae   : > { %2118 = vmatmul.mubr.msk.f32.vlgmr.msra.gmra.mxu1 %vm780_vm2, %v1499_v15 }
 0x6af   : > { %2127 = vmatprep.mubr.msk.f32.mxu1 %vm2600_vm0, %v2599_v0 }
 0x76a   : > { %v1419_v17 = vpop.f32.mrf.mxu1 }
 0x76b   : > { %2113 = vmatmul.mubr.msk.f32.vlgmr.msra.gmra.mxu0 %vm780_vm2, %v1419_v17 }
 0x76c   : > { %v2109_v18 = vpop.f32.mrf.mxu1  ;;  %2122 = vmatprep.mubr.msk.f32.mxu0 %vm2600_vm0, %v2599_v0  ;;  %v1664_v0 = vld [vmem:[#allocation16 + $0x18] sm:$0xff] }
 0x76d   : > { %2126 = vmatpush3.msra.mxu1 %v1664_v0 }
 0x76e   : > { %v1572_v19 = vpop.f32.mrf.mxu1 }
 0x76f   : > { %v1576_v20 = vsel %vm779_vm3, -1e+20, %v1572_v19 }
 0x770   : > { %v2119_v21 = vpop.f32.mrf.mxu1  ;;  %v1577_v22 = vsel %vm780_vm2, %v1576_v20, -inf }
 0x771   : > { %1578 = vmax.xlane.f32.xlu0 %v1577_v22 }
 0x7fa   : > { %v1579_v23 = vpop.xlane.xlu0 %1578 }
 0x7fb   : > { %v1580_v24 = vsub.f32 %v1576_v20, %v1579_v23 }
 0x7fd   : > { %v1581_v27 = vmul.f32 1.442695, %v1580_v24 }
 0x7ff   : > { %2267 = vpow2.f32 %v1581_v27 }
 0x80c   : > { %v2268_v28 = vpop.eup %2267 }
 0x80d   : > { %v1583_v29 = vsel %vm780_vm2, %v2268_v28, 0.0 }
 0x80e   : > { %1584 = vadd.xlane.f32.xlu1 %v1583_v29 }
 0x81f   : > { %1588 = vrot.lane.b32.xlu1 %v2939_v25, %s2603_s22 }
 0x82b   : > { %v1493_v26 = vpop.f32.mrf.mxu0 }
 0x82c   : > { %v1497_v31 = vadd.f32 %v1493_v26, %v1254_v30 }
 0x82d   : > { %v2114_v32 = vpop.f32.mrf.mxu0 }
 0x897   : > { %v1585_v33 = vpop.xlane.xlu1 %1584 }
 0x898   : > { %2269 = vrcp.f32 %v1585_v33 }
 0x89b   : > { %v1589_v34 = vpop.permute.xlu1 %1588 }
 0x89c   : > { %2121 = vmatpush3.msra.mxu0 %v1589_v34 }
 0x8a5   : > { %v2270_v35 = vpop.eup %2269 }
 0x8a6   : > { %v1587_v36 = vmul.f32 %v2270_v35, %v2268_v28 }
 0x8a8   : > { %2123 = vmatmul.mubr.msk.f32.vlgmr.msra.gmra.mxu0 %vm780_vm2, %v1587_v36 }
 0x968   : > { %v1660_v37 = vpop.f32.mrf.mxu0 }
 0x969   : > { %2128 = vmatmul.mubr.msk.f32.vlgmr.msra.gmra.mxu1 %vm780_vm2, %v1660_v37 }
 0x96a   : > { %v2124_v25 = vpop.f32.mrf.mxu0 }
 0xa29   : > { %v1734_v38 = vpop.f32.mrf.mxu1 }
 0xa2a   : > { %v1738_v40 = vadd.f32 %v1734_v38, %v1497_v31 }
 0xa2b   : > { %v2129_v41 = vpop.f32.mrf.mxu1 }
 0xa2c   : > { %v1746_v42 = vadd.f32 %v1993_v39, %v1738_v40 }
 0xa2e   : > { %1747 = vst.msk [vmem:[%s533_s30] sm:$0xff] %vm544_vm1, %v1746_v42 }
 0xa2f   : > { %2500 = shalt.err (!%p2497_p12)
}
 0xa30   : > { %s2501_s5 = scalar_lea.hbm %s1761_s20, 128  ;;  %s2505_s21 = scalar_lea.hbm %s3115_s9, 256 }
 0xa31   : > { %p2502_p1 = scmp.ne.s32.totalorder %s1761_s20, %s2501_s5  ;;  %p2506_p9 = scmp.lt.s32.totalorder %s1761_s20, %s3115_s9 }
 0xa32   : > { %p2507_p11 = scmp.lt.s32.totalorder %s2505_s21, %s2501_s5 }
 0xa33   : > { %p2503_p8 = pnand %p2502_p1, %p3116_p2 }
 0xa34   : > { %p2508_p13 = por %p2507_p11, %p2506_p9 }
 0xa35   : > { %p2504_p3 = pneg %p2503_p8 }
 0xa37   : > { %p2509_p4 = pnand %p2508_p13, %p2504_p3 }
 0xa39   : > { %2512 = shalt.err (!%p2509_p4)
}
 0xa3a   : > { %2154 = dma.vmem_to_hbm [thread:$0]  (%p3116_p2), %s1764_s4, 128, %s1761_s20, %s1749_s18  }
 0xa3b PF: > { %s3117_s17 = sld [smem:[#allocation26_spill]]  ;;  %p3120_p10 = scmp.ge.s32.totalorder %s2587_s14, 2 }
 0xa3c   : > { %s3118_s22 = sld [smem:[#allocation28_spill]] }
 0xa41   : > { %s1775_s1 = sand.u32 1, %s3117_s17  }
 0xa42   : > { %p3119_p0 = scmp.ne.s32.totalorder %s3118_s22, 0  ;;  %s1776_s25 = scalar_lea.sflag [#allocation6], %s1775_s1 }
 0xa44   : > { %p2183_p6 = pnand %p3120_p10, %p3119_p0 }
 0xa46   : > { %p2184_p5 = pneg %p2183_p6 }
 0xa48   : > { %2562 = dma.done.wait (%p2184_p5), %s1776_s25, 128  }
 0xa49   : > { %2564 = vsyncadd (%p2184_p5), %s1776_s25, 4294967168  ;;  %s33_s14 = sadd.s32 1, %s2587_s14   ;;  %s3121_s27 = sld [smem:[#allocation30_spill]] }
 0xa4a   : > { %p30_p7 = scmp.ge.s32.totalorder %s33_s14, 4   ;;  %s3122_s12 = sld [smem:[#allocation27_spill]] }
 0xa4b   : > { %s3123_s13 = sld [smem:[#allocation29_spill]]  ;;  %s3124_s30 = smov %s2571_s10 }
 0xa4c   : > { %s3125_s10 = smov %s2575_s11  ;;  %32 = sbr.rel (!%p30_p7) target bundleno = 18 (0x12), region = 158 }
 0xa4f   : > { %s3126_s11 = smov %s3121_s27 }
 0xa51   :  { %1781 = vsyncpa [#allocation5], 1 }
 0xa52   :  { %1783 = vsyncpa [#allocation5 + $0x1], 1 }
 0xa53   :  { %1784 = vsyncpa [#allocation8], 1 }
 0xa54   :  { %1786 = vsyncpa [#allocation8 + $0x1], 1 }
 0xa55   :  { %1787 = vsyncpa [#allocation11], 1 }
 0xa56   :  { %1789 = vsyncpa [#allocation11 + $0x1], 1 }
 0xa57   :  { %1790 = vsyncpa [#allocation14], 1 }
 0xa58   :  { %1791 = vsyncpa [#allocation17], 1 }
 0xa59   :  { %1792 = vsyncpa [#allocation6], 1 }
 0xa5a   :  { %1794 = vsyncpa [#allocation6 + $0x1], 1 }

</bundles_post_ra>
